<compile_context>
chip_gen: v7x
topology: tpu7x:2x2x1
jax: 0.10.0
libtpu: 0.0.40
codegen_flags: <defaults>
</compile_context>

<pallas_src>
import functools

import jax
import jax.numpy as jnp
import numpy as np
from jax.experimental import pallas as pl
from jax.experimental.pallas import tpu as pltpu


def _round_up(v, m):
    return ((v + m - 1) // m) * m


def _vmem_budget_bytes():
    """Usable per-core VMEM budget (capacity minus compiler headroom); conservative fallback."""
    cap = 64 * 1024 * 1024                       # v7x per-TensorCore capacity (smallest generation)
    try:
        if jax.devices()[0].platform == "tpu" and hasattr(pltpu, "get_tpu_info"):
            cap = int(pltpu.get_tpu_info().vmem_capacity_bytes)   # 128 MiB on v5e/v6e
    except Exception:
        pass
    return max(cap - 8 * 1024 * 1024, 24 * 1024 * 1024)


def _step_bytes(tn, tdo, d, halo, n_halos, has_mask, x_itm, mm_itm):
    """Rough per-grid-step VMEM footprint (double-buffered ins/outs + staging scratch)."""
    mb = 1 if has_mask else 0
    b = 2 * tn * (d + mb) * x_itm                # current x (+mask) tile
    b += n_halos * 2 * halo * (d + mb) * x_itm   # prev/next halo rows
    b += 2 * d * tdo * mm_itm + 2 * tdo * 4      # W column tile + f32 bias
    b += 2 * tn * tdo * x_itm                    # output tile
    b += tn * d * mm_itm                         # staging scratch (single copy)
    return b


def _shift_tokens_linear_kernel(shifts, feats, tn, halo, n_seq_tiles, d_tiles,
                                has_mask, has_prev, has_next, *refs):
    """Build the token-shifted activation tile once per (batch, seq-tile), then issue one
    full-K MXU matmul per W column tile."""
    it = iter(refs)
    x_ref = next(it)                                        # (1, TN, D)   current sequence tile
    m_ref = next(it) if has_mask else None                  # (1, TN, 1)   mask (1.0 = keep)
    xp_ref = next(it) if has_prev else None                 # (1, HALO, D) last rows of prev tile
    mp_ref = next(it) if (has_prev and has_mask) else None
    xn_ref = next(it) if has_next else None                 # (1, HALO, D) first rows of next tile
    mn_ref = next(it) if (has_next and has_mask) else None
    w_ref = next(it)                                        # (D, TDo)
    b_ref = next(it)                                        # (1, TDo) f32
    o_ref = next(it)                                        # (1, TN, TDo)
    staged_ref = next(it)                                   # (TN, D) scratch, matmul dtype

    D = x_ref.shape[2]
    segments = len(shifts)
    shift_cols = segments * feats

    # Grid indices are read at the kernel top level (NOT inside the pl.when body): nesting
    # program_id inside a cond branch is what broke the previous version.
    seq_idx = pl.program_id(1)
    is_first = seq_idx == 0
    is_last = seq_idx == n_seq_tiles - 1

    def build_staging():
        x = x_ref[0]                                         # (TN, D)
        if any(s != 0 for s in shifts):
            xs = x[:, :shift_cols]                           # mask only applies to shifted segments
            xm = xs * m_ref[0] if has_mask else xs
        if has_prev:
            xp = xp_ref[0][:, :shift_cols]
            xpm = xp * mp_ref[0] if has_mask else xp
        if has_next:
            xn = xn_ref[0][:, :shift_cols]
            xnm = xn * mn_ref[0] if has_mask else xn

        for s, amt in enumerate(shifts):
            lo = s * feats
            hi = lo + feats
            if amt == 0:
                seg = x[:, lo:hi]
            elif amt > 0:                    # shift to later positions, zero-fill the front
                a = amt                      # wrapper guarantees a <= halo <= TN
                if has_prev:
                    top = xpm[halo - a:, lo:hi]
                    top = jnp.where(is_first, jnp.zeros_like(top), top)
                else:                        # single sequence tile: front fill is always zero
                    top = jnp.zeros((a, feats), x.dtype)
                seg = top if a >= tn else jnp.concatenate([top, xm[:tn - a, lo:hi]], axis=0)
            else:                            # shift to earlier positions, zero-fill the back
                k = -amt
                if has_next:
                    bot = xnm[:k, lo:hi]
                    bot = jnp.where(is_last, jnp.zeros_like(bot), bot)
                else:
                    bot = jnp.zeros((k, feats), x.dtype)
                seg = bot if k >= tn else jnp.concatenate([xm[k:, lo:hi], bot], axis=0)
            # NOTE: lane-aligned segment boundaries (feats % 128 == 0) make these stores unmasked.
            staged_ref[:, lo:hi] = seg.astype(staged_ref.dtype)

        if shift_cols < D:                   # leftover features pass through unshifted
            staged_ref[:, shift_cols:] = x[:, shift_cols:].astype(staged_ref.dtype)

    if d_tiles == 1:
        build_staging()
    else:
        # Staging depends only on (b, seq-tile); the innermost grid axis streams W column tiles
        # over the persistent scratch, so build it only at j == 0 and reuse for j > 0.
        pl.when(pl.program_id(2) == 0)(build_staging)

    acc = jnp.dot(staged_ref[...], w_ref[...], preferred_element_type=jnp.float32)
    o_ref[0] = (acc + b_ref[...]).astype(o_ref.dtype)


def shift_tokens_linear(x, mask, W, b, shifts, *, seq_tile=None, out_tile=None,
                        matmul_dtype=jnp.bfloat16):
    """ShiftTokens(shifts, fn=Linear(D, D)) forward.

    x: (B, N, D), mask: (B, N) bool (True = keep) or None, W: (D, D), b: (D,).
    seq_tile:  sequence tile TN (must divide N; multiple of 8 unless == N).
    out_tile:  W/output column tile TDo (must divide D; multiple of 128 unless == D).
    matmul_dtype: MXU dtype (default bfloat16; accumulation is always f32).
    """
    B, N, D = x.shape
    shifts = tuple(int(s) for s in shifts)
    segments = len(shifts)
    if segments == 0:
        raise ValueError("shifts must be non-empty")
    feats = D // segments
    if feats == 0:
        raise ValueError("D must be >= len(shifts)")
    # The PyTorch reference clamps positive shifts to the sequence length.
    shifts = tuple(min(s, N) if s > 0 else s for s in shifts)
    max_abs_shift = max(abs(s) for s in shifts)
    any_shift = max_abs_shift > 0
    has_mask = mask is not None
    if max_abs_shift > N:
        # TODO(synk): |negative shift| > N (degenerate all-zero segment) is rejected rather than
        # emulated; F.pad in the reference would also fail on a crop larger than the sequence.
        raise ValueError("negative shifts larger than the sequence length are not supported")

    mm_dtype = jnp.dtype(matmul_dtype) if matmul_dtype is not None else jnp.dtype(x.dtype)
    x_itm = np.dtype(x.dtype).itemsize
    mm_itm = np.dtype(mm_dtype).itemsize
    halo = _round_up(max_abs_shift, 8) if any_shift else 0
    budget = _vmem_budget_bytes()

    # --- W / output column tile -------------------------------------------------------------
    if out_tile is not None:
        TDo = int(out_tile)
    else:
        if 2 * D * D * mm_itm <= budget // 2:
            TDo = D                                   # whole W stays VMEM-resident
        else:
            TDo = None
            for c in range(D, 127, -1):               # largest 128-multiple divisor that fits
                if D % c == 0 and c % 128 == 0 and 2 * D * c * mm_itm <= budget // 4:
                    TDo = c
                    break
            if TDo is None:
                TDo = 128 if D % 128 == 0 else D
    if D % TDo != 0:
        raise ValueError(f"out_tile={TDo} must divide D={D}")
    if TDo != D and TDo % 128 != 0:
        raise ValueError("out_tile must be a multiple of 128 (or equal to D)")

    # --- sequence tile ----------------------------------------------------------------------
    if seq_tile is not None:
        TN = int(seq_tile)
    else:
        cands = [d for d in range(N, 0, -1) if N % d == 0 and (d % 8 == 0 or d == N)]
        valid = []
        for c in cands:
            n_t = N // c
            if c < max_abs_shift:
                continue
            if any_shift and n_t > 1 and c % halo != 0:
                continue
            n_halos = 0
            if n_t > 1:
                n_halos = int(any(s > 0 for s in shifts)) + int(any(s < 0 for s in shifts))
            if _step_bytes(c, TDo, D, halo, n_halos, has_mask, x_itm, mm_itm) > budget:
                continue
            valid.append(c)
        if not valid:
            raise ValueError("could not find a sequence tile fitting the VMEM budget")
        TN = valid[0]
        if B == 1 and N // TN < 2:                    # v7x megacore: give the 2nd TensorCore work
            for c in valid:
                if N // c >= 2 and 2 * c >= TN:
                    TN = c
                    break

    if N % TN != 0:
        raise ValueError(f"seq_tile={TN} must divide N={N}")
    if TN != N and TN % 8 != 0:
        raise ValueError("seq_tile must be a multiple of 8 (or equal to N)")
    if max_abs_shift > TN:
        raise ValueError("need max|shift| <= seq_tile (halo covers one neighbouring tile)")
    n_tiles = N // TN
    d_tiles = D // TDo
    need_prev = any(s > 0 for s in shifts) and n_tiles > 1
    need_next = any(s < 0 for s in shifts) and n_tiles > 1
    if (need_prev or need_next) and TN % halo != 0:
        raise ValueError("seq_tile must be a multiple of round_up(max|shift|, 8) when N is tiled")

    Wc = W.astype(mm_dtype)
    bias = b.reshape(1, D).astype(jnp.float32)

    x_map = lambda bi, ni, ji: (bi, ni, 0)
    in_specs = [pl.BlockSpec((1, TN, D), x_map)]
    operands = [x]
    if has_mask:
        mask_f = mask.astype(x.dtype).reshape(B, N, 1)
        in_specs.append(pl.BlockSpec((1, TN, 1), x_map))
        operands.append(mask_f)

    if need_prev or need_next:
        r = TN // halo                                # halo blocks per sequence tile
        h_blocks = N // halo
    if need_prev:
        prev_map = lambda bi, ni, ji: (bi, jnp.maximum(ni * r - 1, 0), 0)
        in_specs.append(pl.BlockSpec((1, halo, D), prev_map))
        operands.append(x)
        if has_mask:
            in_specs.append(pl.BlockSpec((1, halo, 1), prev_map))
            operands.append(mask_f)
    if need_next:
        next_map = lambda bi, ni, ji: (bi, jnp.minimum((ni + 1) * r, h_blocks - 1), 0)
        in_specs.append(pl.BlockSpec((1, halo, D), next_map))
        operands.append(x)
        if has_mask:
            in_specs.append(pl.BlockSpec((1, halo, 1), next_map))
            operands.append(mask_f)

    in_specs += [pl.BlockSpec((D, TDo), lambda bi, ni, ji: (0, ji)),
                 pl.BlockSpec((1, TDo), lambda bi, ni, ji: (0, ji))]
    operands += [Wc, bias]
    # TODO(synk): when TDo == D the W block never changes; pipeline_mode=pl.Buffered(1) would drop
    # its second VMEM buffer (and Buffered(3) would deepen prefetch when W is streamed), but
    # buffer_count support varies across jax versions, so the budget accounts for 2 buffers instead.

    kernel = functools.partial(_shift_tokens_linear_kernel, shifts, feats, TN, halo,
                               n_tiles, d_tiles, has_mask, need_prev, need_next)

    flops = 2 * B * N * D * D
    bytes_accessed = x.size * x_itm + Wc.size * mm_itm + B * N * D * x_itm
    if has_mask:
        bytes_accessed += B * N * x_itm

    return pl.pallas_call(
        kernel,
        out_shape=jax.ShapeDtypeStruct((B, N, D), x.dtype),
        grid_spec=pltpu.PrefetchScalarGridSpec(
            num_scalar_prefetch=0,
            grid=(B, n_tiles, d_tiles),
            in_specs=in_specs,
            out_specs=pl.BlockSpec((1, TN, TDo), lambda bi, ni, ji: (bi, ni, ji)),
            scratch_shapes=[pltpu.VMEM((TN, D), mm_dtype)],
        ),
        compiler_params=pltpu.CompilerParams(
            dimension_semantics=("parallel", "parallel", "arbitrary"),
            vmem_limit_bytes=int(budget),
        ),
        cost_estimate=pl.CostEstimate(flops=flops, transcendentals=0,
                                      bytes_accessed=int(bytes_accessed)),
    )(*operands)


# ---------------- pure-JAX reference (mirrors the PyTorch module) ----------------
def _ref_shift(t, amount, mask):
    if amount == 0:
        return t
    amount = min(amount, t.shape[1])
    if mask is not None:
        t = jnp.where(mask[..., None], t, 0.0)
    n = t.shape[1]
    if amount > 0:
        pad = jnp.zeros((t.shape[0], amount, t.shape[2]), t.dtype)
        return jnp.concatenate([pad, t[:, :n - amount]], axis=1)
    aa = -amount
    pad = jnp.zeros((t.shape[0], aa, t.shape[2]), t.dtype)
    return jnp.concatenate([t[:, aa:], pad], axis=1)


def _ref_forward(x, mask, W, b, shifts):
    segments = len(shifts)
    D = x.shape[-1]
    F = D // segments
    n_chunks = -(-D // F)
    chunks = [x[..., i * F:min((i + 1) * F, D)] for i in range(n_chunks)]
    to_shift, rest = chunks[:segments], chunks[segments:]
    shifted = [_ref_shift(t, a, mask) for t, a in zip(to_shift, shifts)]
    xs = jnp.concatenate(shifted + rest, axis=-1)
    return xs @ W + b                              # fn = Linear(D, D)


if __name__ == "__main__":
    # --- test 1: single sequence tile, masked; f32 MXU (tight) + default bf16 MXU (loose) ---
    B, N, D = 2, 8, 32
    shifts = (0, 1)
    k1, k2, k3 = jax.random.split(jax.random.PRNGKey(0), 3)
    x = jax.random.normal(k1, (B, N, D), jnp.float32)
    W = jax.random.normal(k2, (D, D), jnp.float32) * (1.0 / np.sqrt(D))
    b = jax.random.normal(k3, (D,), jnp.float32) * 0.01
    mask = jnp.arange(N)[None, :] < jnp.array([N - 2, N])[:, None]   # True = keep
    ref = _ref_forward(x, mask, W, b, shifts)

    out = shift_tokens_linear(x, mask, W, b, shifts, matmul_dtype=jnp.float32)
    jax.block_until_ready(out)
    np.testing.assert_allclose(np.asarray(out), np.asarray(ref), rtol=1e-4, atol=1e-4)

    out_bf = shift_tokens_linear(x, mask, W, b, shifts)               # default bf16 MXU path
    jax.block_until_ready(out_bf)
    np.testing.assert_allclose(np.asarray(out_bf), np.asarray(ref), rtol=3e-2, atol=3e-2)

    # --- test 2: tiled sequence + tiled W columns + negative shift (both halo paths) ---
    B2, N2, D2 = 2, 32, 384
    shifts2 = (0, 1, -1)
    k4, k5, k6 = jax.random.split(jax.random.PRNGKey(1), 3)
    x2 = jax.random.normal(k4, (B2, N2, D2), jnp.float32)
    W2 = jax.random.normal(k5, (D2, D2), jnp.float32) * (1.0 / np.sqrt(D2))
    b2 = jax.random.normal(k6, (D2,), jnp.float32) * 0.01
    mask2 = jnp.arange(N2)[None, :] < jnp.array([N2 - 5, N2])[:, None]
    ref2 = _ref_forward(x2, mask2, W2, b2, shifts2)

    out2 = shift_tokens_linear(x2, mask2, W2, b2, shifts2, seq_tile=16, out_tile=128,
                               matmul_dtype=jnp.float32)
    jax.block_until_ready(out2)
    np.testing.assert_allclose(np.asarray(out2), np.asarray(ref2), rtol=1e-4, atol=1e-4)

    out2_bf = shift_tokens_linear(x2, mask2, W2, b2, shifts2, seq_tile=16, out_tile=128)
    jax.block_until_ready(out2_bf)
    np.testing.assert_allclose(np.asarray(out2_bf), np.asarray(ref2), rtol=5e-2, atol=5e-2)

    # --- test 3: no mask, auto tiles, B=1 (megacore split heuristic), larger shifts ---
    B3, N3, D3 = 1, 32, 256
    shifts3 = (2, -3)
    k7, k8, k9 = jax.random.split(jax.random.PRNGKey(2), 3)
    x3 = jax.random.normal(k7, (B3, N3, D3), jnp.float32)
    W3 = jax.random.normal(k8, (D3, D3), jnp.float32) * (1.0 / np.sqrt(D3))
    b3 = jax.random.normal(k9, (D3,), jnp.float32) * 0.01
    ref3 = _ref_forward(x3, None, W3, b3, shifts3)

    out3 = shift_tokens_linear(x3, None, W3, b3, shifts3, matmul_dtype=jnp.float32)
    jax.block_until_ready(out3)
    np.testing.assert_allclose(np.asarray(out3), np.asarray(ref3), rtol=1e-4, atol=1e-4)

    print("KERNEL_OK")
</pallas_src>

<mosaic_0001>
module attributes {stable_mosaic.version = 11 : i64} {
  func.func @_shift_tokens_linear_kernel(%arg0: i32, %arg1: i32, %arg2: i32, %arg3: memref<1x8x32xf32, #tpu.memory_space<vmem>>, %arg4: memref<1x8x1xf32, #tpu.memory_space<vmem>>, %arg5: memref<32x32xf32, #tpu.memory_space<vmem>>, %arg6: memref<1x32xf32, #tpu.memory_space<vmem>>, %arg7: memref<1x8x32xf32, #tpu.memory_space<vmem>>, %arg8: memref<8x32xf32, #tpu.memory_space<vmem>>) attributes {dimension_semantics = [#tpu.dimension_semantics<parallel>, #tpu.dimension_semantics<parallel>, #tpu.dimension_semantics<arbitrary>], iteration_bounds = array<i64: 2, 1, 1>, scalar_prefetch = 0 : i64, scratch_operands = 1 : i64, tpu.core_type = #tpu.core_type<tc>, window_params = [{transform_indices = @transform_0, window_bounds = array<i64: 1, 8, 32>}, {transform_indices = @transform_1, window_bounds = array<i64: 1, 8, 1>}, {transform_indices = @transform_2, window_bounds = array<i64: 32, 32>}, {transform_indices = @transform_3, window_bounds = array<i64: 1, 32>}, {transform_indices = @transform_4, window_bounds = array<i64: 1, 8, 32>}]} {
    %c0 = arith.constant 0 : index
    %c0_0 = arith.constant 0 : index
    %c0_1 = arith.constant 0 : index
    %0 = vector.load %arg3[%c0, %c0_0, %c0_1] : memref<1x8x32xf32, #tpu.memory_space<vmem>>, vector<1x8x32xf32>
    %1 = vector.shape_cast %0 : vector<1x8x32xf32> to vector<8x32xf32>
    %c0_2 = arith.constant 0 : index
    %c0_3 = arith.constant 0 : index
    %c0_4 = arith.constant 0 : index
    %2 = vector.load %arg4[%c0_2, %c0_3, %c0_4] : memref<1x8x1xf32, #tpu.memory_space<vmem>>, vector<1x8x1xf32>
    %3 = vector.shape_cast %2 : vector<1x8x1xf32> to vector<8x1xf32>
    %4 = vector.broadcast %3 : vector<8x1xf32> to vector<8x32xf32>
    %5 = arith.mulf %1, %4 : vector<8x32xf32>
    %6 = vector.extract_strided_slice %1 {offsets = [0, 0], sizes = [8, 16], strides = [1, 1]} : vector<8x32xf32> to vector<8x16xf32>
    %c0_5 = arith.constant 0 : index
    %c0_6 = arith.constant 0 : index
    %7 = vector.load %arg8[%c0_5, %c0_6] : memref<8x32xf32, #tpu.memory_space<vmem>>, vector<8x16xf32>
    tpu.vector_store %arg8[%c0_5, %c0_6], %6 {strides = array<i32>} : memref<8x32xf32, #tpu.memory_space<vmem>>, vector<8x16xf32>,
    %cst = arith.constant 0.000000e+00 : f32
    %8 = vector.broadcast %cst : f32 to vector<1x16xf32>
    %9 = vector.extract_strided_slice %5 {offsets = [0, 16], sizes = [7, 16], strides = [1, 1]} : vector<8x32xf32> to vector<7x16xf32>
    %10 = tpu.concatenate %8, %9 in 0 : vector<1x16xf32>, vector<7x16xf32> -> vector<8x16xf32>
    %c0_7 = arith.constant 0 : index
    %c16 = arith.constant 16 : index
    %11 = vector.load %arg8[%c0_7, %c16] : memref<8x32xf32, #tpu.memory_space<vmem>>, vector<8x16xf32>
    tpu.vector_store %arg8[%c0_7, %c16], %10 {strides = array<i32>} : memref<8x32xf32, #tpu.memory_space<vmem>>, vector<8x16xf32>,
    %c0_8 = arith.constant 0 : index
    %c0_9 = arith.constant 0 : index
    %12 = vector.load %arg8[%c0_8, %c0_9] : memref<8x32xf32, #tpu.memory_space<vmem>>, vector<8x32xf32>
    %c0_10 = arith.constant 0 : index
    %c0_11 = arith.constant 0 : index
    %13 = vector.load %arg5[%c0_10, %c0_11] : memref<32x32xf32, #tpu.memory_space<vmem>>, vector<32x32xf32>
    %cst_12 = arith.constant dense<0.000000e+00> : vector<8x32xf32>
    %14 = tpu.matmul %12, %13, %cst_12 {dimension_numbers = #tpu.dot_dimension_numbers<[1], [0], [0], [1], [0, 0, 1, 1], [], []>} : vector<8x32xf32>, vector<32x32xf32>, vector<8x32xf32> -> vector<8x32xf32>
    %c0_13 = arith.constant 0 : index
    %c0_14 = arith.constant 0 : index
    %15 = vector.load %arg6[%c0_13, %c0_14] : memref<1x32xf32, #tpu.memory_space<vmem>>, vector<1x32xf32>
    %16 = vector.broadcast %15 : vector<1x32xf32> to vector<8x32xf32>
    %17 = arith.addf %14, %16 : vector<8x32xf32>
    %c0_15 = arith.constant 0 : index
    %c0_16 = arith.constant 0 : index
    %c0_17 = arith.constant 0 : index
    %18 = vector.load %arg7[%c0_15, %c0_16, %c0_17] : memref<1x8x32xf32, #tpu.memory_space<vmem>>, vector<1x8x32xf32>
    %19 = vector.shape_cast %18 : vector<1x8x32xf32> to vector<8x32xf32>
    %20 = vector.shape_cast %17 : vector<8x32xf32> to vector<1x8x32xf32>
    tpu.vector_store %arg7[%c0_15, %c0_16, %c0_17], %20 {strides = array<i32>} : memref<1x8x32xf32, #tpu.memory_space<vmem>>, vector<1x8x32xf32>,
    return
  }
  func.func @transform_0(%arg0: i32, %arg1: i32, %arg2: i32) -> (i32, i32, i32) {
    %c0_i32 = arith.constant 0 : i32
    %c0_i32_0 = arith.constant 0 : i32
    return %arg0, %arg1, %c0_i32 : i32, i32, i32
  }
  func.func @transform_1(%arg0: i32, %arg1: i32, %arg2: i32) -> (i32, i32, i32) {
    %c0_i32 = arith.constant 0 : i32
    %c0_i32_0 = arith.constant 0 : i32
    return %arg0, %arg1, %c0_i32 : i32, i32, i32
  }
  func.func @transform_2(%arg0: i32, %arg1: i32, %arg2: i32) -> (i32, i32) {
    %c0_i32 = arith.constant 0 : i32
    %c0_i32_0 = arith.constant 0 : i32
    return %c0_i32, %arg2 : i32, i32
  }
  func.func @transform_3(%arg0: i32, %arg1: i32, %arg2: i32) -> (i32, i32) {
    %c0_i32 = arith.constant 0 : i32
    %c0_i32_0 = arith.constant 0 : i32
    return %c0_i32, %arg2 : i32, i32
  }
  func.func @transform_4(%arg0: i32, %arg1: i32, %arg2: i32) -> (i32, i32, i32) {
    %c0_i32 = arith.constant 0 : i32
    return %arg0, %arg1, %arg2 : i32, i32, i32
  }
}

</mosaic_0001>

<bundles_post_ra>
// kernel: tpu_custom_call.1
= control target key start
LH: loop header
LB: loop body
LE: loop exit
PB: predicated region body
PF: predicated region fallthrough
CT: control target
= control target key end

     0   :  { %9 = vsyncpa [#allocation4], 0  ;;  %s950_s0 = inlined_call_operand.vmem [shape: f32[2,8,32], index: 0, kind: input, shape index: {}]   ;;  %s951_s1 = inlined_call_operand.vmem [shape: f32[2,8,1], index: 1, kind: input, shape index: {}]   ;;  %s952_s2 = inlined_call_operand.hbm [shape: f32[32,32], index: 2, kind: input, shape index: {}]   ;;  %s953_s3 = inlined_call_operand.vmem [shape: f32[1,32], index: 3, kind: input, shape index: {}]   ;;  %s954_s4 = inlined_call_operand.hbm [shape: f32[2,8,32], index: 4, kind: output, shape index: {}]  }
   0x1   :  { %10 = vsyncpa [#allocation5], 0 }
   0x2   :  { %12 = vsyncpa [#allocation5 + $0x1], 0  ;;  %s794_s15 = smov 0   ;;  %s796_s16 = smov 0  }
   0x3   :  { %s798_s17 = smov 0   ;;  %s800_s18 = smov 0  }
   0x4   :  { %s802_s19 = smov 0   ;;  %s804_s20 = smov 0  }
   0x5 LB: > { %s533_s21 = sadd.s32 4294967295, %s757_s20   ;;  %s534_s22 = sadd.s32 4294967294, %s757_s20   ;;  %s757_s20 = sphi %s804_s20, %s18_s20   ;;  %s753_s19 = sphi %s802_s19, %s972_s19   ;;  %s749_s18 = sphi %s800_s18, %s971_s18   ;;  %s745_s17 = sphi %s798_s17, %s970_s17   ;;  %s741_s16 = sphi %s796_s16, %s969_s16   ;;  %s737_s15 = sphi %s794_s15, %s968_s15  }
   0x6   : > { %s37_s23 = sadd.s32 1, %s753_s19  ;;  %s156_s24 = sadd.s32 1, %s745_s17 }
   0x7   : > { %p39_p0 = scmp.ge.s32.totalorder %s37_s23, 2  ;;  %p166_p1 = scmp.ne.s32.totalorder %s745_s17, %s741_s16 }
   0x8   : > { %p167_p2 = scmp.eq.s32.totalorder %s533_s21, 1  ;;  %p172_p3 = scmp.ne.s32.totalorder %s741_s16, %s737_s15 }
   0x9   : > { %s974_s23 = smov (%p39_p0, %s37_s23), 0  ;;  %p173_p5 = scmp.eq.s32.totalorder %s534_s22, 1 }
   0xa   : > { %p834_p4 = por %p167_p2, %p166_p1  ;;  %s149_s26 = ssub.s32 %s753_s19, %s974_s23 }
   0xb   : > { %p535_p6 = scmp.ge.s32.totalorder %s757_s20, 1  ;;  %p154_p7 = scmp.eq.s32.totalorder %s149_s26, 0 }
   0xc   : > { %s959_s25 = scalar_select %p834_p4, 1, 0 }
   0xd   : > { %p841_p8 = por %p173_p5, %p172_p3  ;;  %p180_p9 = scmp.lt.s32.totalorder %s757_s20, 3 }
   0xe   : > { %s847_s28 = scalar_select %p154_p7, %s745_s17, %s156_s24  }
   0xf   : > { %s960_s27 = scalar_select %p841_p8, 1, 0 }
  0x10   : > { %p849_p10 = pnand %p535_p6, %p180_p9  ;;  %p853_p11 = scmp.eq.s32.totalorder %s533_s21, 0 }
  0x11   : > { %s759_s5 = smov [#allocation3]   ;;  %s647_s10 = scalar_lea.hbm %s952_s2, 512 }
  0x12   : > { %s961_s29 = scalar_select %p849_p10, 1, 0 }
  0x13   : > { %s962_s30 = scalar_select %p853_p11, 1, 0 }
  0x14   : > { %p578_p12 = pneg %p849_p10  ;;  %s194_s6 = sshll.u32 %s759_s5, 4  ;;  %s195_s6 = int_to_ptr.vmem [resolvable:$true] %s194_s6 }
  0x15   : > { %p648_p0 = scmp.ne.s32.totalorder %s952_s2, %s647_s10  ;;  %p654_p5 = scmp.lt.u32.totalorder %s647_s10, %s952_s2 }
  0x16   : > { %p861_p13 = pnand %p853_p11, %p578_p12 }
  0x18   : > { %p649_p1 = pneg %p861_p13 }
  0x1a   : > { %p650_p2 = pnand %p649_p1, %p648_p0 }
  0x1c   : > { %p651_p3 = pneg %p650_p2 }
  0x1e   : > { %p656_p6 = pnand %p654_p5, %p651_p3 }
  0x20   : > { %659 = shalt.err (!%p656_p6)
}
  0x21   : > { %s660_s21 = scalar_lea.vmem %s195_s6, 512  ;;  %p668_p8 = scmp.lt.s32.totalorder %s195_s6, %s195_s6 }
  0x22   : > { %p661_p7 = scmp.ne.s32.totalorder %s195_s6, %s660_s21  ;;  %p669_p4 = scmp.lt.s32.totalorder %s660_s21, %s660_s21 }
  0x24   : > { %p663_p9 = pnand %p661_p7, %p649_p1  ;;  %p670_p11 = por %p669_p4, %p668_p8 }
  0x26   : > { %p664_p12 = pneg %p663_p9 }
  0x28   : > { %p671_p10 = pnand %p670_p11, %p664_p12 }
  0x2a   : > { %674 = shalt.err (!%p671_p10)
}
  0x2b   : > { %s760_s22 = smov 128   ;;  %s761_s24 = smov 8  }
  0x2c   : > { %581 = dma.hbm_to_vmem [thread:$0]  (!%p861_p13), %s952_s2, 512, %s195_s6, [#allocation4], %s760_s22, %s760_s22, %s761_s24  }
  0x2d   : > { %p964_p0 = scmp.ne.s32.totalorder %s961_s29, 0 }
  0x2e   : > { %p965_p2 = scmp.ne.s32.totalorder (!%p964_p0), %s962_s30, 0 }
  0x2f   : > { %236 = sbr.rel (%p964_p0) target bundleno = 661 (0x295), region = 36 }
  0x36   : > { %728 = dma.done.wait (%p965_p2), [#allocation4], 512  }
  0x37   : > { %730 = vsyncadd (%p965_p2), [#allocation4], 4294966784  ;;  %p274_p4 = scmp.lt.s32.totalorder %s749_s18, 1  ;;  %v762_v0 = vmov 0   ;;  %vm299_vm0 = vcmask 130048   ;;  %s763_s30 = smov 112  }
  0x38   : > { %646 = vset.pattern.permute.xlu0 %v762_v0  ;;  %v315_v6 = vld [vmem:[#allocation3] sm:$0xff]  ;;  %v316_v7 = vld [vmem:[#allocation3 + $0x8] sm:$0xff]  ;;  %v764_v9 = vmov 0.0|0.0   ;;  %v317_v10 = vld [vmem:[#allocation3 + $0x10] sm:$0xff]  ;;  %vm765_vm1 = vmmov 0   ;;  %v766_v13 = vmov 0.0  }
  0x39   : > { %s275_s8 = scalar_select %p274_p4, %s749_s18, 1  ;;  %v567_v8 = vpack.c.bf16 %v316_v7, %v315_v6  ;;  %566 = vmatprep.subr.bf16.mxu0 %v764_v9  ;;  %v318_v11 = vld [vmem:[#allocation3 + $0x18] sm:$0xff]  ;;  %563 = vmatprep.mubr.msk.f32.mxu0 %vm765_vm1, %v766_v13  ;;  %vm306_vm2 = vcmask 1040384   ;;  %vm312_vm3 = vcmask 261248   ;;  %vm326_vm4 = vcmask 261120  }
  0x3a   : > { %v570_v12 = vpack.c.bf16 %v318_v11, %v317_v10  ;;  %s767_s13 = smov 16   ;;  %s271_s14 = sand.u32 1, %s741_s16   ;;  %v544_v18 = vld [vmem:[%s953_s3] ss:$0 sm:$0xff] }
  0x3b   : > { %s542_s7 = sshll.u32 %s275_s8, 3  ;;  %568 = vmatpush3.bf16.msra.mxu0 %v567_v8  ;;  %s541_s21 = sshll.u32 %s271_s14, 3 }
  0x3c   : > { %s287_s6 = scalar_lea.vmem %s951_s1, %s542_s7  ;;  %s280_s12 = scalar_lea.vmem %s950_s0, %s542_s7  ;;  %569 = vmatprep.subr.bf16.mxu0 %v764_v9 }
  0x3d   : > { %v292_v1 = vld [vmem:[%s287_s6] sm:$0xff]  ;;  %s547_s26 = sshll.u32 %s749_s18, 7  ;;  %s273_s5 = scalar_lea.vmem [#allocation6], %s541_s21 }
  0x3e   : > { %v291_v2 = vld [vmem:[%s280_s12] sm:$0xff]  ;;  %295 = vperm.xlu0 %646, %v292_v1   ;;  %s417_s8 = sshll.u32 %s273_s5, 4  ;;  %s903_s10 = scalar_lea.hbm %s954_s4, %s547_s26  ;;  %s905_s8 = int_to_ptr.vmem [resolvable:$true] %s417_s8 }
  0x3f   : > { %300 = vst.msk [vmem:[#allocation2] sm:$0xff] %vm299_vm0, %v291_v2  ;;  %571 = vmatpush3.bf16.msra.mxu0 %v570_v12  ;;  %s402_s6 = scalar_lea.sflag [#allocation5], %s271_s14  ;;  %s675_s11 = scalar_lea.vmem %s905_s8, 128 }
  0x40   : > { %p676_p8 = scmp.ne.s32.totalorder %s905_s8, %s675_s11  ;;  %p966_p10 = scmp.ne.s32.totalorder %s959_s25, 0 }
  0x41   : > { %s768_s18 = smov [#allocation6]  }
  0x42   : > { %p677_p11 = pnand %p676_p8, %p966_p10  ;;  %s679_s29 = sshll.u32 %s768_s18, 4  ;;  %s680_s29 = int_to_ptr.vmem [resolvable:$false] %s679_s29 }
  0x43   : > { %s681_s12 = scalar_lea.vmem %s680_s29, 256  ;;  %p682_p1 = scmp.lt.s32.totalorder %s905_s8, %s680_s29 }
  0x44   : > { %p678_p13 = pneg %p677_p11  ;;  %p683_p3 = scmp.lt.s32.totalorder %s681_s12, %s675_s11 }
  0x46   : > { %p684_p5 = por %p683_p3, %p682_p1 }
  0x48   : > { %p685_p6 = pnand %p684_p5, %p678_p13 }
  0xbd   : > { %v296_v3 = vpop.permute.xlu0 %295 }
  0xbe   : > { %v298_v4 = vmul.f32 %v296_v3, %v291_v2 }
  0xc0   : > { %v302_v5 = vrot.slane %v298_v4, 7 }
  0xc2   : > { %303 = vrot.lane.b32.xlu0 %v302_v5, %s763_s30 }
 0x134   : > { %v304_v14 = vpop.permute.xlu0 %303 }
 0x135   : > { %v307_v15 = vsel %vm306_vm2, 0.0, %v304_v14 }
 0x136   : > { %309 = vrot.lane.b32.xlu1 %v307_v15, %s767_s13 }
 0x1a8   : > { %v310_v16 = vpop.permute.xlu1 %309 }
 0x1a9   : > { %313 = vst.msk [vmem:[#allocation2] sm:$0xff] %vm312_vm3, %v310_v16 }
 0x1b0   : > { %v314_v17 = vld [vmem:[#allocation2] sm:$0xff] }
 0x1b1   : > { %564 = vmatmul.mubr.msk.f32.vlgmr.msra.gmra.mrb[0].mxu0 %vm326_vm4, %v314_v17 }
 0x284   : > { %v396_v19 = vpop.f32.mrb[0].mxu0 }
 0x285   : > { %v397_v20 = vadd.f32 %v544_v18, %v396_v19  ;;  %v565_v21 = vpop.f32.mrb[1].mxu0 }
 0x287   : > { %400 = vst.msk [vmem:[%s273_s5] sm:$0xff] %vm326_vm4, %v397_v20 }
 0x288   : > { %688 = shalt.err (!%p685_p6)
}
 0x289   : > { %s689_s30 = scalar_lea.hbm %s903_s10, 128  ;;  %s693_s21 = scalar_lea.hbm %s954_s4, 256 }
 0x28a   : > { %p690_p7 = scmp.ne.s32.totalorder %s903_s10, %s689_s30  ;;  %p694_p0 = scmp.lt.u32.totalorder %s903_s10, %s954_s4 }
 0x28b   : > { %p695_p2 = scmp.lt.u32.totalorder %s693_s21, %s689_s30  ;;  %p697_p8 = scmp.lt.u32.totalorder %s689_s30, %s903_s10 }
 0x28c   : > { %p691_p9 = pnand %p690_p7, %p966_p10 }
 0x28d   : > { %p696_p4 = por %p695_p2, %p694_p0 }
 0x28e   : > { %p692_p12 = pneg %p691_p9 }
 0x28f   : > { %p698_p11 = por %p697_p8, %p696_p4 }
 0x291   : > { %p699_p13 = pnand %p698_p11, %p692_p12 }
 0x293   : > { %702 = shalt.err (!%p699_p13)
}
 0x294   : > { %576 = dma.vmem_to_hbm [thread:$0]  (%p966_p10), %s905_s8, 128, %s903_s10, %s402_s6  }
 0x295 PF: > { %p588_p1 = scmp.ge.s32.totalorder %s757_s20, 2  ;;  %s429_s26 = sand.u32 1, %s737_s15  }
 0x296   : > { %p967_p3 = scmp.ne.s32.totalorder %s960_s27, 0  ;;  %s430_s5 = scalar_lea.sflag [#allocation5], %s429_s26 }
 0x298   : > { %p583_p5 = pnand %p588_p1, %p967_p3 }
 0x29a   : > { %732 = dma.done.wait (!%p583_p5), %s430_s5, 128  }
 0x29b   : > { %734 = vsyncadd (!%p583_p5), %s430_s5, 4294967168  ;;  %s18_s20 = sadd.s32 1, %s757_s20   ;;  %s968_s15 = smov %s741_s16 }
 0x29c   : > { %p15_p6 = scmp.ge.s32.totalorder %s18_s20, 4   ;;  %s969_s16 = smov %s745_s17 }
 0x29d   : > { %s970_s17 = smov %s847_s28  ;;  %s971_s18 = smov %s753_s19 }
 0x29e   : > { %s972_s19 = smov %s974_s23  ;;  %17 = sbr.rel (!%p15_p6) target bundleno = 5 (0x5), region = 83 }
 0x2a5   :  { %435 = vsyncpa [#allocation4], 1 }
 0x2a6   :  { %437 = vsyncpa [#allocation4 + $0x1], 1 }
 0x2a7   :  { %438 = vsyncpa [#allocation5], 1 }
 0x2a8   :  { %440 = vsyncpa [#allocation5 + $0x1], 1 }

</bundles_post_ra>
